<compile_context>
chip_gen: v5e
topology: v5e:2x2
jax: 0.10.0
libtpu: 0.0.40
codegen_flags: <defaults>
</compile_context>

<pallas_src>
import jax
import jax.numpy as jnp
from jax.experimental import pallas as pl
from jax.experimental.pallas import tpu as pltpu

K = 256  # hidden width, matches the PyTorch module


def _critic_kernel(s_ref, a_ref, w1_ref, b1_ref, wo_ref, bo_ref, o_ref, cat_ref):
    s_dim = s_ref.shape[1]
    # Concatenate s and a along the feature axis inside VMEM scratch.
    cat_ref[:, :s_dim] = s_ref[...]
    cat_ref[:, s_dim:] = a_ref[...]
    # One MXU matmul (contraction depth s_dim + a_dim), fused bias, relu.
    h = jnp.maximum(
        jnp.dot(cat_ref[...], w1_ref[...], preferred_element_type=jnp.float32)
        + b1_ref[...],
        0.0,
    )
    # Output layer: VPU multiply by the lane-dense [1, K] weight row, then an
    # XLU lane reduce; scalar bias is read from SMEM.
    q = jnp.sum(h * wo_ref[...], axis=-1, keepdims=True) + bo_ref[0, 0]
    o_ref[...] = q.astype(o_ref.dtype)


def critic_forward(s, a, params, *, tb=None):
    """s: [B, s_dim], a: [B, a_dim] -> q: [B, 1] (float32)."""
    B, s_dim = s.shape
    a_dim = a.shape[1]
    w1, b1, wo, bo = params
    assert w1.shape == (s_dim + a_dim, K)

    # Batch tile: big enough to amortize per-step overhead, small enough to
    # leave VMEM headroom even on v7x (64 MiB). Working set per row ~1.1 KiB.
    if tb is None:
        tb = B if B <= 512 else 512

    grid = (pl.cdiv(B, tb),)

    in_specs = [
        pl.BlockSpec((tb, s_dim), lambda i: (i, 0)),          # s tile
        pl.BlockSpec((tb, a_dim), lambda i: (i, 0)),          # a tile
        pl.BlockSpec((s_dim + a_dim, K), lambda i: (0, 0)),   # w1 (resident)
        pl.BlockSpec((1, K), lambda i: (0, 0)),               # fused bias (resident)
        pl.BlockSpec((1, K), lambda i: (0, 0)),               # wo row (resident)
        pl.BlockSpec(memory_space=pltpu.MemorySpace.SMEM),    # bo scalar
    ]
    out_specs = pl.BlockSpec((tb, 1), lambda i: (i, 0))

    return pl.pallas_call(
        _critic_kernel,
        out_shape=jax.ShapeDtypeStruct((B, 1), jnp.float32),
        grid=grid,
        in_specs=in_specs,
        out_specs=out_specs,
        scratch_shapes=[pltpu.VMEM((tb, s_dim + a_dim), jnp.float32)],
        compiler_params=pltpu.CompilerParams(
            dimension_semantics=("parallel",)),
    )(s, a, w1, b1, wo, bo)


def init_critic_params(key, s_dim, a_dim):
    """Deterministic init matching the PyTorch module's __init__:
    weights ~ Normal(0, 0.1); biases use nn.Linear's default
    Uniform(-1/sqrt(fan_in), 1/sqrt(fan_in)). Weights are then packed for the
    kernel: first-layer weights concatenated to [s_dim+a_dim, K], biases fused
    to one [1, K] row, output weight kept lane-dense as [1, K]."""
    k = jax.random.split(key, 6)
    # fcs: Linear(s_dim, K)
    ws = jax.random.normal(k[0], (K, s_dim), jnp.float32) * 0.1
    bs = jax.random.uniform(k[1], (1, K), jnp.float32,
                            -1.0 / jnp.sqrt(s_dim), 1.0 / jnp.sqrt(s_dim))
    # fca: Linear(a_dim, K)
    wa = jax.random.normal(k[2], (K, a_dim), jnp.float32) * 0.1
    ba = jax.random.uniform(k[3], (1, K), jnp.float32,
                            -1.0 / jnp.sqrt(a_dim), 1.0 / jnp.sqrt(a_dim))
    # out: Linear(K, 1)
    wo = jax.random.normal(k[4], (1, K), jnp.float32) * 0.1
    bo = jax.random.uniform(k[5], (1, 1), jnp.float32,
                            -1.0 / jnp.sqrt(K), 1.0 / jnp.sqrt(K))

    w1 = jnp.concatenate([ws.T, wa.T], axis=0)   # [s_dim + a_dim, K]
    b1 = bs + ba                                 # fused first-layer bias [1, K]
    return (w1, b1, wo, bo)


def critic_ref(s, a, params):
    w1, b1, wo, bo = params
    h = jnp.maximum(jnp.concatenate([s, a], axis=1) @ w1 + b1, 0.0)
    return h @ wo.T + bo


# TODO(synk): shut_down_grad() is a training-time grad toggle; no forward-pass
# equivalent in a Pallas kernel.

if __name__ == "__main__":
    key = jax.random.PRNGKey(0)
    kp, ks, ka = jax.random.split(key, 3)

    batch, s_dim, a_dim = 8, 16, 8
    params = init_critic_params(kp, s_dim, a_dim)
    s = jax.random.normal(ks, (batch, s_dim), jnp.float32)
    a = jax.random.normal(ka, (batch, a_dim), jnp.float32)

    q = jax.block_until_ready(critic_forward(s, a, params))
    q_ref = critic_ref(s, a, params)

    assert q.shape == (batch, 1), q.shape
    assert jnp.allclose(q, q_ref, atol=1e-4, rtol=1e-4), (q, q_ref)
    print("KERNEL_OK")
</pallas_src>

<mosaic_0001>
module attributes {stable_mosaic.version = 11 : i64} {
  func.func @_critic_kernel(%arg0: i32, %arg1: memref<8x16xf32, #tpu.memory_space<vmem>>, %arg2: memref<8x8xf32, #tpu.memory_space<vmem>>, %arg3: memref<24x256xf32, #tpu.memory_space<vmem>>, %arg4: memref<1x256xf32, #tpu.memory_space<vmem>>, %arg5: memref<1x256xf32, #tpu.memory_space<vmem>>, %arg6: memref<1x1xf32, #tpu.memory_space<smem>>, %arg7: memref<8x1xf32, #tpu.memory_space<vmem>>, %arg8: memref<8x24xf32, #tpu.memory_space<vmem>>) attributes {dimension_semantics = [#tpu.dimension_semantics<parallel>], iteration_bounds = array<i64: 1>, scalar_prefetch = 0 : i64, scratch_operands = 1 : i64, tpu.core_type = #tpu.core_type<tc>, window_params = [{transform_indices = @transform_0, window_bounds = array<i64: 8, 16>}, {transform_indices = @transform_1, window_bounds = array<i64: 8, 8>}, {pipeline_mode = #tpu.pipeline_mode<synchronous>, transform_indices = @transform_2, window_bounds = array<i64: 24, 256>}, {pipeline_mode = #tpu.pipeline_mode<synchronous>, transform_indices = @transform_3, window_bounds = array<i64: 1, 256>}, {pipeline_mode = #tpu.pipeline_mode<synchronous>, transform_indices = @transform_4, window_bounds = array<i64: 1, 256>}, {transform_indices = @transform_5, window_bounds = array<i64: 1, 1>}, {transform_indices = @transform_6, window_bounds = array<i64: 8, 1>}]} {
    %c0 = arith.constant 0 : index
    %c0_0 = arith.constant 0 : index
    %0 = vector.load %arg1[%c0, %c0_0] : memref<8x16xf32, #tpu.memory_space<vmem>>, vector<8x16xf32>
    %c0_1 = arith.constant 0 : index
    %c0_2 = arith.constant 0 : index
    %1 = vector.load %arg8[%c0_1, %c0_2] : memref<8x24xf32, #tpu.memory_space<vmem>>, vector<8x16xf32>
    tpu.vector_store %arg8[%c0_1, %c0_2], %0 {strides = array<i32>} : memref<8x24xf32, #tpu.memory_space<vmem>>, vector<8x16xf32>,
    %c0_3 = arith.constant 0 : index
    %c0_4 = arith.constant 0 : index
    %2 = vector.load %arg2[%c0_3, %c0_4] : memref<8x8xf32, #tpu.memory_space<vmem>>, vector<8x8xf32>
    %c0_5 = arith.constant 0 : index
    %c16 = arith.constant 16 : index
    %3 = vector.load %arg8[%c0_5, %c16] : memref<8x24xf32, #tpu.memory_space<vmem>>, vector<8x8xf32>
    tpu.vector_store %arg8[%c0_5, %c16], %2 {strides = array<i32>} : memref<8x24xf32, #tpu.memory_space<vmem>>, vector<8x8xf32>,
    %c0_6 = arith.constant 0 : index
    %c0_7 = arith.constant 0 : index
    %4 = vector.load %arg8[%c0_6, %c0_7] : memref<8x24xf32, #tpu.memory_space<vmem>>, vector<8x24xf32>
    %c0_8 = arith.constant 0 : index
    %c0_9 = arith.constant 0 : index
    %5 = vector.load %arg3[%c0_8, %c0_9] : memref<24x256xf32, #tpu.memory_space<vmem>>, vector<24x256xf32>
    %cst = arith.constant dense<0.000000e+00> : vector<8x256xf32>
    %6 = tpu.matmul %4, %5, %cst {dimension_numbers = #tpu.dot_dimension_numbers<[1], [0], [0], [1], [0, 0, 1, 1], [], []>} : vector<8x24xf32>, vector<24x256xf32>, vector<8x256xf32> -> vector<8x256xf32>
    %c0_10 = arith.constant 0 : index
    %c0_11 = arith.constant 0 : index
    %7 = vector.load %arg4[%c0_10, %c0_11] : memref<1x256xf32, #tpu.memory_space<vmem>>, vector<1x256xf32>
    %8 = vector.broadcast %7 : vector<1x256xf32> to vector<8x256xf32>
    %9 = arith.addf %6, %8 : vector<8x256xf32>
    %cst_12 = arith.constant 0.000000e+00 : f32
    %10 = vector.broadcast %cst_12 : f32 to vector<8x256xf32>
    %11 = arith.maximumf %9, %10 : vector<8x256xf32>
    %c0_13 = arith.constant 0 : index
    %c0_14 = arith.constant 0 : index
    %12 = vector.load %arg5[%c0_13, %c0_14] : memref<1x256xf32, #tpu.memory_space<vmem>>, vector<1x256xf32>
    %13 = vector.broadcast %12 : vector<1x256xf32> to vector<8x256xf32>
    %14 = arith.mulf %11, %13 : vector<8x256xf32>
    %cst_15 = arith.constant dense<0.000000e+00> : vector<8xf32>
    %15 = vector.multi_reduction <add>, %14, %cst_15 [1] : vector<8x256xf32> to vector<8xf32>
    %16 = vector.shape_cast %15 : vector<8xf32> to vector<8x1xf32>
    %c0_16 = arith.constant 0 : index
    %c0_17 = arith.constant 0 : index
    %17 = memref.load %arg6[%c0_16, %c0_17] : memref<1x1xf32, #tpu.memory_space<smem>>
    %18 = vector.broadcast %17 : f32 to vector<8x1xf32>
    %19 = arith.addf %16, %18 : vector<8x1xf32>
    %c0_18 = arith.constant 0 : index
    %c0_19 = arith.constant 0 : index
    %20 = vector.load %arg7[%c0_18, %c0_19] : memref<8x1xf32, #tpu.memory_space<vmem>>, vector<8x1xf32>
    tpu.vector_store %arg7[%c0_18, %c0_19], %19 {strides = array<i32>} : memref<8x1xf32, #tpu.memory_space<vmem>>, vector<8x1xf32>,
    return
  }
  func.func @transform_0(%arg0: i32) -> (i32, i32) {
    %c0_i32 = arith.constant 0 : i32
    %c0_i32_0 = arith.constant 0 : i32
    return %arg0, %c0_i32 : i32, i32
  }
  func.func @transform_1(%arg0: i32) -> (i32, i32) {
    %c0_i32 = arith.constant 0 : i32
    %c0_i32_0 = arith.constant 0 : i32
    return %arg0, %c0_i32 : i32, i32
  }
  func.func @transform_2(%arg0: i32) -> (i32, i32) {
    %c0_i32 = arith.constant 0 : i32
    %c0_i32_0 = arith.constant 0 : i32
    %c0_i32_1 = arith.constant 0 : i32
    return %c0_i32, %c0_i32_0 : i32, i32
  }
  func.func @transform_3(%arg0: i32) -> (i32, i32) {
    %c0_i32 = arith.constant 0 : i32
    %c0_i32_0 = arith.constant 0 : i32
    %c0_i32_1 = arith.constant 0 : i32
    return %c0_i32, %c0_i32_0 : i32, i32
  }
  func.func @transform_4(%arg0: i32) -> (i32, i32) {
    %c0_i32 = arith.constant 0 : i32
    %c0_i32_0 = arith.constant 0 : i32
    %c0_i32_1 = arith.constant 0 : i32
    return %c0_i32, %c0_i32_0 : i32, i32
  }
  func.func @transform_5(%arg0: i32) -> (i32, i32) {
    %c0_i32 = arith.constant 0 : i32
    %c0_i32_0 = arith.constant 0 : i32
    %c0_i32_1 = arith.constant 0 : i32
    return %c0_i32, %c0_i32_0 : i32, i32
  }
  func.func @transform_6(%arg0: i32) -> (i32, i32) {
    %c0_i32 = arith.constant 0 : i32
    %c0_i32_0 = arith.constant 0 : i32
    return %arg0, %c0_i32 : i32, i32
  }
}

</mosaic_0001>

<bundles_post_ra>
// kernel: tpu_custom_call.1
= control target key start
LH: loop header
LB: loop body
LE: loop exit
PB: predicated region body
PF: predicated region fallthrough
CT: control target
= control target key end

     0   :  { %12 = vsyncpa [#allocation5], 0  ;;  %s302_s0 = inlined_call_operand.hbm [shape: f32[8,16], index: 0, kind: input, shape index: {}]   ;;  %s303_s1 = inlined_call_operand.hbm [shape: f32[8,8], index: 1, kind: input, shape index: {}]   ;;  %s304_s2 = inlined_call_operand.hbm [shape: f32[24,256], index: 2, kind: input, shape index: {}]   ;;  %s305_s3 = inlined_call_operand.vmem [shape: f32[1,256], index: 3, kind: input, shape index: {}]   ;;  %s306_s4 = inlined_call_operand.vmem [shape: f32[1,256], index: 4, kind: input, shape index: {}]   ;;  %s307_s5 = inlined_call_operand.<no memory space> [shape: f32[1,1], index: 5, kind: input, shape index: {}]   ;;  %s308_s6 = inlined_call_operand.vmem [shape: f32[8,1], index: 6, kind: output, shape index: {}]  }
   0x1   :  { %13 = vsyncpa [#allocation7], 0  ;;  %s30_s23 = sshll.u32 %s303_s1, 4  ;;  %s241_s24 = smov [#allocation6]   ;;  %s31_s23 = int_to_ptr.hbm [resolvable:$true] %s30_s23 }
   0x2   :  { %s32_s25 = sshll.u32 %s241_s24, 4  ;;  %s19_s28 = sshll.u32 %s302_s0, 4  ;;  %s33_s25 = int_to_ptr.vmem [resolvable:$true] %s32_s25  ;;  %s20_s28 = int_to_ptr.hbm [resolvable:$true] %s19_s28 }
   0x3   :  { %35 = dma.hbm_to_vmem [thread:$0]  %s31_s23, 128, %s33_s25, [#allocation7]  }
   0x4   :  { %s242_s29 = smov [#allocation4]   ;;  %s40_s9 = sshll.u32 %s304_s2, 4  ;;  %s41_s9 = int_to_ptr.hbm [resolvable:$true] %s40_s9 }
   0x5   :  { %s21_s30 = sshll.u32 %s242_s29, 4  ;;  %s243_s1 = smov [#allocation8]   ;;  %s22_s30 = int_to_ptr.vmem [resolvable:$true] %s21_s30 }
   0x6   :  { %24 = dma.hbm_to_vmem [thread:$0]  %s20_s28, 128, %s22_s30, [#allocation5]  }
   0x7   :  { %s42_s10 = sshll.u32 %s243_s1, 4  ;;  %s244_s11 = smov 256   ;;  %s43_s10 = int_to_ptr.vmem [resolvable:$true] %s42_s10 }
   0x8   :  { %s245_s12 = smov 16  }
   0x9   :  { %48 = dma.hbm_to_vmem [thread:$0]  %s41_s9, 768, %s43_s10, [#allocation7], %s244_s11, %s244_s11, %s245_s12  }
   0xa   :  { %237 = dma.done.wait [#allocation5], 128  }
   0xb   :  { %238 = vsyncadd [#allocation5], 4294967168 }
   0xc   :  { %239 = dma.done.wait [#allocation7], 896  }
   0xd   :  { %240 = vsyncadd [#allocation7], 4294966400  ;;  %v70_v0 = vld [vmem:[#allocation6] sm:$0xff]  ;;  %vm68_vm0 = vcmask 130048   ;;  %v67_v1 = vld [vmem:[#allocation4] sm:$0xff]  ;;  %vm75_vm1 = vcmask 195712   ;;  %v148_v25 = vstv %s307_s5 }
   0xe   :  { %72 = vrot.lane.b32.xlu0 %v70_v0, %s245_s12  ;;  %69 = vst.msk [vmem:[#allocation2] sm:$0xff] %vm68_vm0, %v67_v1  ;;  %v82_v2 = vld [vmem:[#allocation8 + $0x20] sm:$0xff]  ;;  %v83_v3 = vld [vmem:[#allocation8 + $0x28] sm:$0xff]  ;;  %v80_v4 = vld [vmem:[#allocation8 + $0x10] sm:$0xff]  ;;  %vm90_vm2 = vcmask 195584   ;;  %vm150_vm3 = vcmask 7168  }
   0xf   :  { %107 = vmatpush.msra.mxu0 %v82_v2  ;;  %127 = vmatpush.msra.mxu1 %v83_v3  ;;  %v81_v5 = vld [vmem:[#allocation8 + $0x18] sm:$0xff]  ;;  %v78_v6 = vld [vmem:[#allocation8] sm:$0xff]  ;;  %v79_v7 = vld [vmem:[#allocation8 + $0x8] sm:$0xff] }
  0x10   :  { %v84_v10 = vld [vmem:[%s305_s3] sm:$0x3] }
  0x11   :  { %108 = vmatpush.msra.mxu0 %v80_v4  ;;  %128 = vmatpush.msra.mxu1 %v81_v5  ;;  %v86_v11 = vperm.slane %v84_v10, 0  ;;  %v87_v12 = vperm.slane %v84_v10, 1  ;;  %v136_v13 = vld [vmem:[%s306_s4] sm:$0x3] }
  0x12   :  { %v138_v17 = vperm.slane %v136_v13, 0  ;;  %v139_v19 = vperm.slane %v136_v13, 1 }
  0x13   :  { %109 = vmatpush.msra.mxu0 %v78_v6  ;;  %129 = vmatpush.msra.mxu1 %v79_v7 }
  0x80   :  { %v73_v8 = vpop.permute.xlu0 %72 }
  0x81   :  { %76 = vst.msk [vmem:[#allocation2] sm:$0xff] %vm75_vm1, %v73_v8 }
  0x88   :  { %v77_v9 = vld [vmem:[#allocation2] sm:$0xff] }
  0x89   :  { %158 = vmatmul.msk.f32.vlgmr.msra.gmra.mxu0 %vm90_vm2, %v77_v9  ;;  %159 = vmatmul.msk.f32.vlgmr.msra.gmra.mxu1 %vm90_vm2, %v77_v9 }
 0x106   :  { %v111_v14 = vpop.f32.mrf.mxu0  ;;  %v131_v15 = vpop.f32.mrf.mxu1 }
 0x107   :  { %v112_v16 = vadd.f32 %v111_v14, %v86_v11  ;;  %v132_v18 = vadd.f32 %v131_v15, %v87_v12 }
 0x109   :  { %v134_v20 = vmax.f32 %v112_v16, 0.0  ;;  %v135_v21 = vmax.f32 %v132_v18, 0.0 }
 0x10b   :  { %v142_v22 = vmul.f32 %v138_v17, %v134_v20  ;;  %v143_v23 = vmul.f32 %v139_v19, %v135_v21 }
 0x10d   :  { %v144_v24 = vadd.f32 %v143_v23, %v142_v22 }
 0x10f   :  { %145 = vadd.xlane.f32.xlu0 %v144_v24 }
 0x182   :  { %v146_v26 = vpop.xlane.xlu0 %145 }
 0x183   :  { %v149_v27 = vadd.f32 %v148_v25, %v146_v26 }
 0x185   :  { %151 = vst.msk [vmem:[%s308_s6] sm:$0xff] %vm150_vm3, %v149_v27 }
 0x186   :  { %156 = vsyncpa [#allocation5], 1 }
 0x187   :  { %157 = vsyncpa [#allocation7], 1 }

</bundles_post_ra>
